<compile_context>
chip_gen: v7x
topology: tpu7x:2x2x1
jax: 0.10.0
libtpu: 0.0.40
codegen_flags: <defaults>
</compile_context>

<pallas_src>
import functools
from dataclasses import dataclass

import jax
import jax.numpy as jnp
from jax.experimental import pallas as pl
from jax.experimental.pallas import tpu as pltpu


# ----------------------------------------------------------------------------
# Minimal stand-in for e3nn.o3.Irreps / Irrep (only what ExtractIrreps needs).
# ----------------------------------------------------------------------------
@dataclass(frozen=True)
class Irrep:
    l: int
    p: int  # +1 ('e') or -1 ('o')

    @property
    def dim(self) -> int:
        return 2 * self.l + 1

    @staticmethod
    def parse(s: str) -> "Irrep":
        s = s.strip()
        l = int(s[:-1])
        p = {"e": 1, "o": -1}[s[-1]]
        return Irrep(l, p)


def parse_irreps(s: str):
    """Parse '4x0e + 2x1o + 3x0e' -> list of (mul, Irrep)."""
    out = []
    for term in s.split("+"):
        term = term.strip()
        if "x" in term:
            mul_str, ir_str = term.split("x")
            mul = int(mul_str)
        else:
            mul, ir_str = 1, term
        out.append((mul, Irrep.parse(ir_str)))
    return out


def irreps_slices(irreps):
    """Same as e3nn Irreps.slices(): contiguous slices per (mul, ir) entry."""
    slices, off = [], 0
    for mul, ir in irreps:
        size = mul * ir.dim
        slices.append((off, size))
        off += size
    return slices, off  # (list of (start, size), total dim)


def _sublane_multiple(dtype) -> int:
    """Row-tile granularity: 8 for 32-bit, 16 for 16-bit, 32 for 8-bit."""
    itemsize = jnp.dtype(dtype).itemsize
    return max(8, 32 // max(itemsize, 1))


def _round_up(x: int, m: int) -> int:
    return ((x + m - 1) // m) * m


def _vmem_capacity_bytes() -> int:
    """Per-TensorCore VMEM capacity; conservative fallback if query fails."""
    try:
        return int(pltpu.get_tpu_info().vmem_capacity_bytes)
    except Exception:
        return 64 * 1024 * 1024  # v7x per-core VMEM (smallest current gen)


class ExtractIrreps:
    """JAX/Pallas port of e3tools.nn.ExtractIrreps."""

    def __init__(self, irreps_in: str, irrep_extract: str):
        self.irreps_in = parse_irreps(irreps_in)
        self.irrep_extract = Irrep.parse(irrep_extract)

        all_slices, self.dim_in = irreps_slices(self.irreps_in)
        raw_slices = []           # list of (start_in, size)
        self.irreps_out = []
        for (mul, ir), (start, size) in zip(self.irreps_in, all_slices):
            if (ir.l, ir.p) == (self.irrep_extract.l, self.irrep_extract.p):
                raw_slices.append((start, size))
                self.irreps_out.append((mul, ir))
        if len(raw_slices) == 0:
            raise ValueError(
                f"Irreps {irrep_extract} not found in {irreps_in}"
            )

        # Coalesce adjacent slices (start_{k+1} == start_k + size_k) so the
        # unrolled kernel body does fewer, wider copies.
        merged = [list(raw_slices[0])]
        for start, size in raw_slices[1:]:
            if start == merged[-1][0] + merged[-1][1]:
                merged[-1][1] += size
            else:
                merged.append([start, size])
        self.slices = [tuple(s) for s in merged]
        self.dim_out = sum(size for _, size in self.slices)

    # ------------------------------------------------------------------
    # Pallas kernel: copy static lane ranges from x tile into packed out tile.
    # ------------------------------------------------------------------
    def _kernel(self, x_ref, o_ref):
        out_off = 0
        for start, size in self.slices:  # static Python loop (unrolled)
            o_ref[:, out_off:out_off + size] = x_ref[:, start:start + size]
            out_off += size

    # NOTE: static_argnums=0 hashes `self` by identity -> each instance
    # retraces once (benign for a fixed set of modules).
    @functools.partial(jax.jit, static_argnums=0)
    def __call__(self, data: jnp.ndarray) -> jnp.ndarray:
        assert data.shape[-1] == self.dim_in, (
            f"expected last dim {self.dim_in}, got {data.shape[-1]}"
        )
        lead_shape = data.shape[:-1]
        n_rows = 1
        for d in lead_shape:
            n_rows *= d
        x2d = data.reshape(n_rows, self.dim_in)

        dtype = x2d.dtype
        itemsize = jnp.dtype(dtype).itemsize
        sub = _sublane_multiple(dtype)
        rows_rounded = _round_up(n_rows, sub)

        # ---- Tile sizing (lane-padding aware) --------------------------------
        # Each VMEM block pads its last dim to 128 lanes, and Pallas double-
        # buffers both input and output blocks.
        pad_in = _round_up(self.dim_in, 128)
        pad_out = _round_up(self.dim_out, 128)
        bytes_per_row = 2 * (pad_in + pad_out) * itemsize  # x2 double-buffer

        vmem_cap = _vmem_capacity_bytes()
        budget_bytes = int(vmem_cap * 0.40)   # headroom for compiler scratch
        tm = budget_bytes // max(bytes_per_row, 1)
        tm = max(sub, (tm // sub) * sub)
        tm = min(tm, rows_rounded)

        # Guarantee >= ~4 grid steps (when the input allows it) so v7x's two
        # TensorCores both get work and DMA overlaps compute.  For large
        # inputs the VMEM cap above already yields many steps.
        if rows_rounded >= 2 * sub:
            steps = min(4, rows_rounded // sub)
            tm = min(tm, max(sub, _round_up(pl.cdiv(rows_rounded, steps), sub)))

        grid = (pl.cdiv(n_rows, tm),)

        # Explicit scoped-VMEM limit: actual padded footprint + headroom,
        # never more than 75% of physical VMEM for this generation.
        footprint = 2 * tm * (pad_in + pad_out) * itemsize
        vmem_limit = int(min(int(vmem_cap * 0.75),
                             max(footprint + (2 << 20), 16 << 20)))

        # Purely memory-bound op: tell XLA's scheduler.
        cost = pl.CostEstimate(
            flops=0,
            transcendentals=0,
            bytes_accessed=n_rows * (self.dim_in + self.dim_out) * itemsize,
        )

        # No host-side padding: Pallas pads the ragged last block internally;
        # out-of-bounds output writes of that block are discarded.
        out2d = pl.pallas_call(
            self._kernel,
            out_shape=jax.ShapeDtypeStruct((n_rows, self.dim_out), dtype),
            grid_spec=pl.GridSpec(
                grid=grid,
                in_specs=[pl.BlockSpec((tm, self.dim_in), lambda i: (i, 0))],
                out_specs=pl.BlockSpec((tm, self.dim_out), lambda i: (i, 0)),
            ),
            compiler_params=pltpu.CompilerParams(
                dimension_semantics=("parallel",),
                vmem_limit_bytes=vmem_limit,
            ),
            cost_estimate=cost,
        )(x2d)

        return out2d.reshape(*lead_shape, self.dim_out)


# ----------------------------------------------------------------------------
# Pure-JAX reference (mirrors the torch.cat of slices).
# ----------------------------------------------------------------------------
def extract_ref(module: ExtractIrreps, data: jnp.ndarray) -> jnp.ndarray:
    return jnp.concatenate(
        [data[..., s:s + n] for s, n in module.slices], axis=-1
    )


if __name__ == "__main__":
    # irreps_in = "4x0e + 2x1o + 3x0e + 1x2e"  -> dim = 4 + 6 + 3 + 5 = 18
    # extract "0e" -> slices [0:4] and [10:13] -> dim_out = 7
    irreps_in = "4x0e + 2x1o + 3x0e + 1x2e"
    irrep_extract = "0e"

    module = ExtractIrreps(irreps_in, irrep_extract)
    key = jax.random.PRNGKey(0)

    # Test 1: small, tile-aligned leading shape (multi-step grid).
    batch, nodes = 2, 16
    x = jax.random.normal(key, (batch, nodes, module.dim_in), dtype=jnp.float32)
    out = jax.block_until_ready(module(x))
    ref = extract_ref(module, x)
    assert out.shape == (batch, nodes, module.dim_out), out.shape
    assert jnp.allclose(out, ref), "mismatch vs reference (aligned case)"

    # Test 2: row count not a multiple of the sublane tile (ragged tail path).
    x2 = jax.random.normal(key, (5, 13, module.dim_in), dtype=jnp.float32)
    out2 = jax.block_until_ready(module(x2))
    ref2 = extract_ref(module, x2)
    assert out2.shape == (5, 13, module.dim_out), out2.shape
    assert jnp.allclose(out2, ref2), "mismatch vs reference (ragged case)"

    # Test 3: bf16 (exercises the 16-row sublane-packing path).
    x3 = jax.random.normal(key, (3, 9, module.dim_in), dtype=jnp.bfloat16)
    out3 = jax.block_until_ready(module(x3))
    ref3 = extract_ref(module, x3)
    assert out3.shape == (3, 9, module.dim_out), out3.shape
    assert jnp.allclose(out3.astype(jnp.float32), ref3.astype(jnp.float32)), \
        "mismatch vs reference (bf16 case)"

    print("KERNEL_OK")
</pallas_src>

<mosaic_0001>
module attributes {stable_mosaic.version = 11 : i64} {
  func.func @_kernel(%arg0: i32, %arg1: memref<8x18xf32, #tpu.memory_space<vmem>>, %arg2: memref<8x7xf32, #tpu.memory_space<vmem>>) attributes {dimension_semantics = [#tpu.dimension_semantics<parallel>], iteration_bounds = array<i64: 4>, scalar_prefetch = 0 : i64, scratch_operands = 0 : i64, tpu.core_type = #tpu.core_type<tc>, window_params = [{transform_indices = @transform_0, window_bounds = array<i64: 8, 18>}, {transform_indices = @transform_1, window_bounds = array<i64: 8, 7>}]} {
    %c0 = arith.constant 0 : index
    %c0_0 = arith.constant 0 : index
    %0 = vector.load %arg1[%c0, %c0_0] : memref<8x18xf32, #tpu.memory_space<vmem>>, vector<8x4xf32>
    %c0_1 = arith.constant 0 : index
    %c0_2 = arith.constant 0 : index
    %1 = vector.load %arg2[%c0_1, %c0_2] : memref<8x7xf32, #tpu.memory_space<vmem>>, vector<8x4xf32>
    tpu.vector_store %arg2[%c0_1, %c0_2], %0 {strides = array<i32>} : memref<8x7xf32, #tpu.memory_space<vmem>>, vector<8x4xf32>,
    %c0_3 = arith.constant 0 : index
    %c10 = arith.constant 10 : index
    %2 = vector.load %arg1[%c0_3, %c10] : memref<8x18xf32, #tpu.memory_space<vmem>>, vector<8x3xf32>
    %c0_4 = arith.constant 0 : index
    %c4 = arith.constant 4 : index
    %3 = vector.load %arg2[%c0_4, %c4] : memref<8x7xf32, #tpu.memory_space<vmem>>, vector<8x3xf32>
    tpu.vector_store %arg2[%c0_4, %c4], %2 {strides = array<i32>} : memref<8x7xf32, #tpu.memory_space<vmem>>, vector<8x3xf32>,
    return
  }
  func.func @transform_0(%arg0: i32) -> (i32, i32) {
    %c0_i32 = arith.constant 0 : i32
    %c0_i32_0 = arith.constant 0 : i32
    return %arg0, %c0_i32 : i32, i32
  }
  func.func @transform_1(%arg0: i32) -> (i32, i32) {
    %c0_i32 = arith.constant 0 : i32
    %c0_i32_0 = arith.constant 0 : i32
    return %arg0, %c0_i32 : i32, i32
  }
}

</mosaic_0001>

<bundles_post_ra>
// kernel: a_call__.1
= control target key start
LH: loop header
LB: loop body
LE: loop exit
PB: predicated region body
PF: predicated region fallthrough
CT: control target
= control target key end

     0   :  { %6 = vsyncpa [#allocation3], 0  ;;  %s442_s0 = inlined_call_operand.hbm [shape: f32[32,18], index: 0, kind: input, shape index: {}]   ;;  %s443_s1 = inlined_call_operand.vmem [shape: f32[32,7], index: 1, kind: output, shape index: {}]  }
   0x1   :  { %8 = vsyncpa [#allocation3 + $0x1], 0  ;;  %s335_s6 = smov 0   ;;  %s337_s7 = smov 0  }
   0x2   :  { %s339_s8 = smov 0   ;;  %s341_s9 = smov 0  }
   0x3 LB: > { %s354_s10 = sadd.s32 4294967295, %s321_s9   ;;  %s357_s11 = sadd.s32 1, %s321_s9   ;;  %s321_s9 = sphi %s341_s9, %s451_s9   ;;  %s317_s8 = sphi %s339_s8, %s450_s8   ;;  %s313_s7 = sphi %s337_s7, %s449_s7   ;;  %s309_s6 = sphi %s335_s6, %s448_s6  }
   0x4   : > { %s18_s12 = ssub.s32 %s321_s9, %s357_s11  ;;  %s21_s13 = sadd.s32 1, %s317_s8 }
   0x5   : > { %p19_p0 = scmp.eq.s32.totalorder %s18_s12, 0  ;;  %p28_p1 = scmp.ne.s32.totalorder %s317_s8, %s313_s7 }
   0x6   : > { %p29_p2 = scmp.eq.s32.totalorder %s321_s9, 0  ;;  %p34_p3 = scmp.ne.s32.totalorder %s313_s7, %s309_s6 }
   0x7   : > { %s367_s14 = scalar_select %p19_p0, %s317_s8, %s21_s13  }
   0x8   : > { %p30_p4 = por %p29_p2, %p28_p1  ;;  %p35_p5 = scmp.eq.s32.totalorder %s354_s10, 0 }
   0x9   : > { %p223_p6 = scmp.lt.s32.totalorder %s321_s9, 4  ;;  %s84_s16 = sand.u32 1, %s317_s8  }
   0xa   : > { %p371_p7 = por %p35_p5, %p34_p3  ;;  %s210_s17 = sshll.u32 %s84_s16, 3 }
   0xb   : > { %s211_s18 = sshll.u32 %s321_s9, 7  ;;  %s88_s22 = scalar_lea.vmem [#allocation2], %s210_s17 }
   0xc   : > { %s380_s21 = scalar_lea.hbm %s442_s0, %s211_s18  ;;  %s95_s23 = sshll.u32 %s88_s22, 4  ;;  %s382_s23 = int_to_ptr.vmem [resolvable:$true] %s95_s23 }
   0xd   : > { %p384_p8 = pnand %p223_p6, %p30_p4  ;;  %s85_s25 = scalar_lea.sflag [#allocation3], %s84_s16 }
   0xe   : > { %s257_s26 = scalar_lea.hbm %s380_s21, 128  ;;  %s262_s29 = scalar_lea.hbm %s442_s0, 512 }
   0xf   : > { %p258_p11 = scmp.ne.s32.totalorder %s380_s21, %s257_s26  ;;  %p259_p12 = pneg %p384_p8 }
  0x10   : > { %p263_p1 = scmp.lt.u32.totalorder %s380_s21, %s442_s0  ;;  %p264_p2 = scmp.lt.u32.totalorder %s262_s29, %s257_s26 }
  0x11   : > { %p260_p13 = pnand %p259_p12, %p258_p11  ;;  %p266_p4 = scmp.lt.u32.totalorder %s257_s26, %s380_s21 }
  0x12   : > { %p265_p3 = por %p264_p2, %p263_p1 }
  0x13   : > { %p261_p0 = pneg %p260_p13 }
  0x14   : > { %p267_p5 = por %p266_p4, %p265_p3 }
  0x16   : > { %p268_p6 = pnand %p267_p5, %p261_p0 }
  0x18   : > { %271 = shalt.err (!%p268_p6)
}
  0x19   : > { %s272_s3 = scalar_lea.vmem %s382_s23, 128  ;;  %s323_s4 = smov [#allocation2]  }
  0x1a   : > { %p273_p11 = scmp.ne.s32.totalorder %s382_s23, %s272_s3  ;;  %s277_s5 = sshll.u32 %s323_s4, 4  ;;  %s278_s5 = int_to_ptr.vmem [resolvable:$false] %s277_s5 }
  0x1b   : > { %s279_s6 = scalar_lea.vmem %s278_s5, 256  ;;  %p280_p10 = scmp.lt.s32.totalorder %s382_s23, %s278_s5 }
  0x1c   : > { %p275_p13 = pnand %p273_p11, %p259_p12  ;;  %p281_p1 = scmp.lt.s32.totalorder %s279_s6, %s272_s3 }
  0x1e   : > { %p276_p9 = pneg %p275_p13  ;;  %p282_p2 = por %p281_p1, %p280_p10 }
  0x20   : > { %p283_p3 = pnand %p282_p2, %p276_p9 }
  0x22   : > { %286 = shalt.err (!%p283_p3)
}
  0x23   : > { %222 = dma.hbm_to_vmem [thread:$0]  (!%p384_p8), %s380_s21, 128, %s382_s23, %s85_s25  }
  0x24   : > { %p446_p0 = scmp.lt.s32.totalorder %s321_s9, 5  ;;  %p447_p4 = scmp.ge.s32.totalorder %s321_s9, 1 }
  0x26   : > { %p101_p12 = pnand %p447_p4, %p446_p0 }
  0x27   : > { %s106_s12 = sand.u32 (!%p101_p12), 1, %s313_s7  }
  0x28   : > { %104 = sbr.rel (%p101_p12) target bundleno = 165 (0xa5), region = 24  ;;  %s213_s13 = sshll.u32 (!%p101_p12), %s106_s12, 3 }
  0x29   : > { %s107_s16 = scalar_lea.sflag (!%p101_p12), [#allocation3], %s106_s12  ;;  %s110_s17 = scalar_lea.vmem (!%p101_p12), [#allocation2], %s213_s13 }
  0x2f   : > { %304 = dma.done.wait (%p371_p7), %s107_s16, 128  }
  0x30   : > { %306 = vsyncadd (%p371_p7), %s107_s16, 4294967168  ;;  %p128_p9 = scmp.lt.s32.totalorder %s354_s10, 3  ;;  %vm133_vm0 = vcmask 31744   ;;  %v132_v0 = vld [vmem:[%s110_s17] sm:$0xff]  ;;  %s324_s21 = smov 122   ;;  %vm140_vm1 = vcmask 56352  }
  0x31   : > { %137 = vrot.lane.b32.xlu0 %v132_v0, %s324_s21 }
  0x32   : > { %s453_s10 = smov (!%p128_p9, %s354_s10), 3 }
  0x33   : > { %s214_s18 = sshll.u32 %s453_s10, 3 }
  0x34   : > { %s131_s20 = scalar_lea.vmem %s443_s1, %s214_s18 }
  0x35   : > { %134 = vst.msk [vmem:[%s131_s20] sm:$0xff] %vm133_vm0, %v132_v0 }
  0xa3   : > { %v138_v1 = vpop.permute.xlu0 %137 }
  0xa4   : > { %141 = vst.msk [vmem:[%s131_s20] sm:$0xff] %vm140_vm1, %v138_v1 }
  0xa5 PF: > { %p11_p7 = scmp.ge.s32.totalorder %s357_s11, 6   ;;  %s448_s6 = smov %s313_s7 }
  0xa6   : > { %s449_s7 = smov %s317_s8  ;;  %s450_s8 = smov %s367_s14 }
  0xa7   : > { %s451_s9 = smov %s357_s11  ;;  %13 = sbr.rel (!%p11_p7) target bundleno = 3 (0x3), region = 64 }
  0xae   :  { %161 = vsyncpa [#allocation3], 1 }
  0xaf   :  { %163 = vsyncpa [#allocation3 + $0x1], 1 }

</bundles_post_ra>
